<compile_context>
chip_gen: v6e
topology: v6e:2x2x1
jax: 0.10.0
libtpu: 0.0.40
codegen_flags: <defaults>
</compile_context>

<pallas_src>
import jax
import jax.numpy as jnp
from jax import lax
from jax.experimental import pallas as pl
from jax.experimental.pallas import tpu as pltpu


def _round_up(x, m):
    return ((x + m - 1) // m) * m


def _vmem_capacity_bytes():
    try:
        return int(pltpu.get_tpu_info().vmem_capacity_bytes)
    except Exception:
        return 64 << 20  # conservative (v7x-sized) fallback


def _vmem_need(tm, K, E_pad, in_bytes, out_bytes):
    """Rough VMEM footprint for one grid step (weight single-buffered)."""
    patches = 2 * tm * K * in_bytes          # double-buffered input tile
    weight = 1 * K * E_pad * in_bytes        # single-buffered resident weight
    bias = 2 * 8 * E_pad * 4                 # padded f32 bias (tiny)
    out = 2 * tm * E_pad * out_bytes         # double-buffered output tile
    acc = tm * E_pad * 4                     # f32 matmul result inside kernel
    return patches + weight + bias + out + acc


def _choose_tm(M, sublane, fits):
    """Rows per tile: sublane-aligned; prefers dividing M exactly (no pad copy,
    no dead last tile), prefers ~512 rows (amortizes the ~0.35us/step grid
    overhead), prefers an even grid length (v7x two-TensorCore balance), and
    must satisfy the VMEM predicate `fits`."""
    if M <= 512:
        tm = _round_up(M, sublane)
        while tm > sublane and not fits(tm):
            tm -= sublane
        return max(tm, sublane)
    cands = [t for t in range(sublane, min(M, 1024) + 1, sublane) if fits(t)]
    if not cands:
        return sublane

    def score(t):
        grid = (M + t - 1) // t
        return (M % t == 0, grid % 2 == 0, -abs(t - 512))

    return max(cands, key=score)


def _patch_embed_kernel(p_ref, w_ref, b_ref, o_ref):
    """One M-tile of the patch projection:  o = p @ w + b.

    p_ref: (TM, K)     patch rows (compute dtype, e.g. bf16)
    w_ref: (K, E_pad)  projection weight, single-buffered / VMEM-resident
    b_ref: (1, E_pad)  bias, f32, single-buffered
    o_ref: (TM, E_pad) output tile (lane-dense: E_pad % 128 == 0)
    """
    acc = jnp.dot(p_ref[...], w_ref[...], preferred_element_type=jnp.float32)
    o_ref[...] = (acc + b_ref[...]).astype(o_ref.dtype)


def patch_embed(x, weight, bias, patch_size, compute_dtype=jnp.bfloat16):
    """x: (B, C, H, W) NCHW.  weight: (E, C, p, p).  bias: (E,).
    Returns (B, num_patches, E)  ==  proj(x).flatten(2).transpose(1, 2).
    Matmul runs in `compute_dtype` with f32 accumulation (pass jnp.float32 for
    exact f32 math)."""
    B, C, H, W = x.shape
    E = weight.shape[0]
    p = patch_size
    assert H % p == 0 and W % p == 0, (
        f"Input image size ({H}*{W}) must be divisible by patch size {p}.")
    gh, gw = H // p, W // p
    num_patches = gh * gw
    M = B * num_patches
    K = C * p * p

    in_bytes = jnp.dtype(compute_dtype).itemsize
    out_dtype = x.dtype
    out_bytes = jnp.dtype(out_dtype).itemsize

    # --- unfold into patch rows (M, K), channel-major within each patch so it
    # matches conv weight.reshape(E, -1).  Cast to the compute dtype *first* so
    # the convert fuses into the transpose copy and the round trip moves half
    # the bytes.
    # TODO(synk): fully fuse this gather into the kernel (memory_space=pl.ANY
    # strip DMA + in-VMEM reorder) to drop the remaining HBM round trip.
    xc = x.astype(compute_dtype)
    xp = xc.reshape(B, C, gh, p, gw, p)
    xp = jnp.transpose(xp, (0, 2, 4, 1, 3, 5))            # (B, gh, gw, C, p, p)
    patches = xp.reshape(M, K)

    # conv weight (E, C, p, p) -> (K, E); pad E only (lane-dense output).
    w_mat = weight.reshape(E, K).T.astype(compute_dtype)  # (K, E)
    E_pad = _round_up(E, 128)
    if E_pad != E:
        w_mat = jnp.pad(w_mat, ((0, 0), (0, E_pad - E)))
    b_mat = jnp.pad(bias.astype(jnp.float32).reshape(1, E),
                    ((0, 0), (0, E_pad - E)))

    # --- tiling: K un-padded (full-dim block), TM ~512 rows, generation-aware
    # VMEM budget.
    sublane = max(8, 32 // in_bytes)        # 8 f32, 16 bf16, 32 int8/fp8
    cap = _vmem_capacity_bytes()
    budget = int(0.65 * cap)
    TM = _choose_tm(
        M, sublane,
        lambda t: _vmem_need(t, K, E_pad, in_bytes, out_bytes) <= budget)
    M_pad = _round_up(M, TM)
    if M_pad != M:
        patches = jnp.pad(patches, ((0, M_pad - M), (0, 0)))

    need = _vmem_need(TM, K, E_pad, in_bytes, out_bytes)
    vmem_limit = int(min(max(need + (8 << 20), 32 << 20), int(0.75 * cap)))

    grid = (M_pad // TM,)

    out = pl.pallas_call(
        _patch_embed_kernel,
        out_shape=jax.ShapeDtypeStruct((M_pad, E_pad), out_dtype),
        grid_spec=pl.GridSpec(
            grid=grid,
            in_specs=[
                # patch rows: pipelined over the M grid axis
                pl.BlockSpec((TM, K), lambda i: (i, 0)),
                # weight / bias: constant index -> single-buffered resident
                pl.BlockSpec((K, E_pad), lambda i: (0, 0),
                             pipeline_mode=pl.Buffered(1)),
                pl.BlockSpec((1, E_pad), lambda i: (0, 0),
                             pipeline_mode=pl.Buffered(1)),
            ],
            out_specs=pl.BlockSpec((TM, E_pad), lambda i: (i, 0)),
        ),
        compiler_params=pltpu.CompilerParams(
            dimension_semantics=("parallel",),
            vmem_limit_bytes=vmem_limit,
            allow_input_fusion=[True, False, False],
        ),
        cost_estimate=pl.CostEstimate(
            flops=2 * M_pad * K * E_pad,
            transcendentals=0,
            bytes_accessed=(M_pad * K * in_bytes + K * E_pad * in_bytes
                            + M_pad * E_pad * out_bytes),
        ),
    )(patches, w_mat, b_mat)

    if M_pad != M or E_pad != E:
        out = out[:M, :E]
    return out.reshape(B, num_patches, E)


def reference_patch_embed(x, weight, bias, patch_size):
    """Pure-JAX reference: conv2d with kernel=stride=patch_size, NCHW."""
    y = lax.conv_general_dilated(
        x, weight,
        window_strides=(patch_size, patch_size),
        padding="VALID",
        dimension_numbers=("NCHW", "OIHW", "NCHW"),
        precision=lax.Precision.HIGHEST,
    ) + bias[None, :, None, None]
    B, E, gh, gw = y.shape
    return jnp.transpose(y.reshape(B, E, gh * gw), (0, 2, 1))


if __name__ == "__main__":
    # Small synthetic configuration consistent with the module:
    # img_size=16, patch_size=4, in_c=4, embed_dim=32, norm_layer=None
    B, C, H, W = 2, 4, 16, 16
    patch_size = 4
    embed_dim = 32

    key = jax.random.PRNGKey(0)
    kx, kw, kb = jax.random.split(key, 3)
    x = jax.random.normal(kx, (B, C, H, W), dtype=jnp.float32)
    weight = jax.random.normal(kw, (embed_dim, C, patch_size, patch_size),
                               dtype=jnp.float32) * 0.02
    bias = jax.random.normal(kb, (embed_dim,), dtype=jnp.float32) * 0.02

    out = patch_embed(x, weight, bias, patch_size)
    out = jax.block_until_ready(out)
    assert out.shape == (B, (H // patch_size) * (W // patch_size), embed_dim)

    # Tight check vs a reference using the same precision policy
    # (bf16-rounded inputs, f32 accumulation): only summation order differs.
    ref_bf16 = reference_patch_embed(
        x.astype(jnp.bfloat16).astype(jnp.float32),
        weight.astype(jnp.bfloat16).astype(jnp.float32),
        bias, patch_size)
    assert jnp.allclose(out, ref_bf16, atol=1e-4, rtol=1e-4), \
        "mismatch vs bf16-policy reference"

    # Loose sanity check vs the full-f32 conv spec (bf16 rounding tolerance).
    ref_f32 = reference_patch_embed(x, weight, bias, patch_size)
    assert jnp.allclose(out, ref_f32, atol=2e-2, rtol=2e-2), \
        "mismatch vs f32 reference"

    print("KERNEL_OK")
</pallas_src>

<mosaic_0001>
module attributes {stable_mosaic.version = 11 : i64} {
  func.func @_patch_embed_kernel(%arg0: i32, %arg1: memref<32x64xbf16, #tpu.memory_space<vmem>>, %arg2: memref<64x128xbf16, #tpu.memory_space<vmem>>, %arg3: memref<1x128xf32, #tpu.memory_space<vmem>>, %arg4: memref<32x128xf32, #tpu.memory_space<vmem>>) attributes {dimension_semantics = [#tpu.dimension_semantics<parallel>], iteration_bounds = array<i64: 1>, scalar_prefetch = 0 : i64, scratch_operands = 0 : i64, tpu.core_type = #tpu.core_type<tc>, window_params = [{transform_indices = @transform_0, window_bounds = array<i64: 32, 64>}, {pipeline_mode = #tpu.pipeline_mode<synchronous>, transform_indices = @transform_1, window_bounds = array<i64: 64, 128>}, {pipeline_mode = #tpu.pipeline_mode<synchronous>, transform_indices = @transform_2, window_bounds = array<i64: 1, 128>}, {transform_indices = @transform_3, window_bounds = array<i64: 32, 128>}]} {
    %c0 = arith.constant 0 : index
    %c0_0 = arith.constant 0 : index
    %0 = vector.load %arg1[%c0, %c0_0] : memref<32x64xbf16, #tpu.memory_space<vmem>>, vector<32x64xbf16>
    %c0_1 = arith.constant 0 : index
    %c0_2 = arith.constant 0 : index
    %1 = vector.load %arg2[%c0_1, %c0_2] : memref<64x128xbf16, #tpu.memory_space<vmem>>, vector<64x128xbf16>
    %cst = arith.constant dense<0.000000e+00> : vector<32x128xf32>
    %2 = tpu.matmul %0, %1, %cst {dimension_numbers = #tpu.dot_dimension_numbers<[1], [0], [0], [1], [0, 0, 1, 1], [], []>} : vector<32x64xbf16>, vector<64x128xbf16>, vector<32x128xf32> -> vector<32x128xf32>
    %c0_3 = arith.constant 0 : index
    %c0_4 = arith.constant 0 : index
    %3 = vector.load %arg3[%c0_3, %c0_4] : memref<1x128xf32, #tpu.memory_space<vmem>>, vector<1x128xf32>
    %4 = vector.broadcast %3 : vector<1x128xf32> to vector<32x128xf32>
    %5 = arith.addf %2, %4 : vector<32x128xf32>
    %c0_5 = arith.constant 0 : index
    %c0_6 = arith.constant 0 : index
    %6 = vector.load %arg4[%c0_5, %c0_6] : memref<32x128xf32, #tpu.memory_space<vmem>>, vector<32x128xf32>
    tpu.vector_store %arg4[%c0_5, %c0_6], %5 {strides = array<i32>} : memref<32x128xf32, #tpu.memory_space<vmem>>, vector<32x128xf32>,
    return
  }
  func.func @transform_0(%arg0: i32) -> (i32, i32) {
    %c0_i32 = arith.constant 0 : i32
    %c0_i32_0 = arith.constant 0 : i32
    return %arg0, %c0_i32 : i32, i32
  }
  func.func @transform_1(%arg0: i32) -> (i32, i32) {
    %c0_i32 = arith.constant 0 : i32
    %c0_i32_0 = arith.constant 0 : i32
    %c0_i32_1 = arith.constant 0 : i32
    return %c0_i32, %c0_i32_0 : i32, i32
  }
  func.func @transform_2(%arg0: i32) -> (i32, i32) {
    %c0_i32 = arith.constant 0 : i32
    %c0_i32_0 = arith.constant 0 : i32
    %c0_i32_1 = arith.constant 0 : i32
    return %c0_i32, %c0_i32_0 : i32, i32
  }
  func.func @transform_3(%arg0: i32) -> (i32, i32) {
    %c0_i32 = arith.constant 0 : i32
    %c0_i32_0 = arith.constant 0 : i32
    return %arg0, %c0_i32 : i32, i32
  }
}

</mosaic_0001>

<bundles_post_ra>
// kernel: tpu_custom_call.1
= control target key start
LH: loop header
LB: loop body
LE: loop exit
PB: predicated region body
PF: predicated region fallthrough
CT: control target
= control target key end

     0   :  { %8 = vsyncpa [#allocation3], 0  ;;  %s320_s0 = inlined_call_operand.hbm [shape: bf16[32,64], index: 0, kind: input, shape index: {}]   ;;  %s321_s1 = inlined_call_operand.hbm [shape: bf16[64,128], index: 1, kind: input, shape index: {}]   ;;  %s322_s2 = inlined_call_operand.vmem [shape: f32[1,128], index: 2, kind: input, shape index: {}]   ;;  %s323_s3 = inlined_call_operand.hbm [shape: f32[32,128], index: 3, kind: output, shape index: {}]  }
   0x1   :  { %9 = vsyncpa [#allocation6], 0 }
   0x2   :  { %10 = vsyncpa [#allocation4], 0  ;;  %s281_s12 = smov [#allocation2]  }
   0x3   :  { %s16_s13 = sshll.u32 %s281_s12, 4  ;;  %s17_s13 = int_to_ptr.vmem [resolvable:$true] %s16_s13 }
   0x4   :  { %s223_s14 = scalar_lea.vmem %s17_s13, 256  ;;  %p228_p1 = scmp.lt.s32.totalorder %s17_s13, %s17_s13 }
   0x5   :  { %p224_p0 = scmp.ne.s32.totalorder %s17_s13, %s223_s14  ;;  %p229_p2 = scmp.lt.s32.totalorder %s223_s14, %s223_s14 }
   0x7   :  { %p230_p3 = por %p229_p2, %p228_p1 }
   0x9   :  { %p231_p4 = pnand %p230_p3, %p224_p0 }
   0xb   :  { %234 = shalt.err (!%p231_p4)
}
   0xc   :  { %s282_s15 = smov 64   ;;  %s283_s16 = smov 4  }
   0xd   :  { %22 = dma.hbm_to_vmem [thread:$0]  %s320_s0, 256, %s17_s13, [#allocation3], %s282_s15, %s282_s15, %s283_s16  }
   0xe   :  { %s284_s19 = smov [#allocation5]  }
   0xf   :  { %s28_s20 = sshll.u32 %s284_s19, 4  ;;  %s29_s20 = int_to_ptr.vmem [resolvable:$true] %s28_s20 }
  0x10   :  { %s243_s21 = scalar_lea.vmem %s29_s20, 512  ;;  %p248_p6 = scmp.lt.s32.totalorder %s29_s20, %s29_s20 }
  0x11   :  { %p244_p5 = scmp.ne.s32.totalorder %s29_s20, %s243_s21  ;;  %p249_p7 = scmp.lt.s32.totalorder %s243_s21, %s243_s21 }
  0x13   :  { %p250_p8 = por %p249_p7, %p248_p6 }
  0x15   :  { %p251_p9 = pnand %p250_p8, %p244_p5 }
  0x17   :  { %254 = shalt.err (!%p251_p9)
}
  0x18   :  { %34 = dma.hbm_to_vmem [thread:$0]  %s321_s1, 512, %s29_s20, [#allocation6], %s282_s15, %s282_s15, %s283_s16  }
  0x19   :  { %275 = dma.done.wait [#allocation3], 256  }
  0x1a   :  { %276 = vsyncadd [#allocation3], 4294967040 }
  0x1b   :  { %277 = dma.done.wait [#allocation6], 512  }
  0x1c   :  { %278 = vsyncadd [#allocation6], 4294966784  ;;  %v209_v0 = vld [vmem:[#allocation5 + $0x18] sm:$0xff]   ;;  %v210_v1 = vld [vmem:[#allocation5 + $0x10] sm:$0xff]   ;;  %vm97_vm0 = vcmask 523264   ;;  %s285_s24 = smov [#allocation7]  }
  0x1d   :  { %190 = vmatprep.subr.bf16.mxu0 %v209_v0  ;;  %v211_v2 = vld [vmem:[#allocation5 + $0x8] sm:$0xff]   ;;  %v213_v3 = vld [vmem:[#allocation2] sm:$0xff]   ;;  %v212_v4 = vld [vmem:[#allocation5] sm:$0xff]   ;;  %s162_s25 = sshll.u32 %s285_s24, 4  ;;  %s163_s25 = int_to_ptr.vmem [resolvable:$true] %s162_s25 }
  0x1e   :  { %191 = vmatpush3.bf16.msra.mxu0 %v209_v0  ;;  %198 = vmatprep.mubr.msk.bf16.mxu0 %vm97_vm0, %v213_v3  ;;  %v214_v5 = vld [vmem:[#allocation2 + $0x8] sm:$0xff]   ;;  %v175_v6 = vld [vmem:[%s322_s2] ss:$0 sm:$0xff]  ;;  %s255_s26 = scalar_lea.vmem %s163_s25, 512  ;;  %p260_p11 = scmp.lt.s32.totalorder %s163_s25, %s163_s25 }
  0x1f   :  { %192 = vmatprep.subr.bf16.mxu0 %v210_v1  ;;  %p256_p10 = scmp.ne.s32.totalorder %s163_s25, %s255_s26  ;;  %p261_p12 = scmp.lt.s32.totalorder %s255_s26, %s255_s26 }
  0x21   :  { %p262_p13 = por %p261_p12, %p260_p11 }
  0x22   :  { %193 = vmatpush3.bf16.msra.mxu0 %v210_v1 }
  0x23   :  { %194 = vmatprep.subr.bf16.mxu0 %v211_v2  ;;  %p263_p0 = pnand %p262_p13, %p256_p10 }
  0x26   :  { %195 = vmatpush3.bf16.msra.mxu0 %v211_v2 }
  0x27   :  { %196 = vmatprep.subr.bf16.mxu0 %v212_v4 }
  0x2a   :  { %197 = vmatpush3.bf16.msra.mxu0 %v212_v4 }
  0x2d   :  { %199 = vmatmul.mubr.msk.bf16.vlgmr.msra.gmra.mxu0 %vm97_vm0, %v214_v5 }
  0xed   :  { %v200_v7 = vpop.f32.mrf.mxu0 }
  0xee   :  { %v147_v8 = vadd.f32 %v200_v7, %v175_v6 }
  0xef   :  { %v138_v9 = vpop.f32.mrf.mxu0 }
  0xf0   :  { %155 = vst [vmem:[#allocation7 + $0x10] sm:$0xff] %v147_v8  ;;  %v139_v10 = vadd.f32 %v175_v6, %v138_v9 }
  0xf1   :  { %v201_v11 = vpop.f32.mrf.mxu0 }
  0xf2   :  { %153 = vst [vmem:[#allocation7] sm:$0xff] %v139_v10  ;;  %v150_v12 = vadd.f32 %v201_v11, %v175_v6 }
  0xf3   :  { %v141_v13 = vpop.f32.mrf.mxu0 }
  0xf4   :  { %156 = vst [vmem:[#allocation7 + $0x18] sm:$0xff] %v150_v12  ;;  %v142_v14 = vadd.f32 %v175_v6, %v141_v13 }
  0xf6   :  { %154 = vst [vmem:[#allocation7 + $0x8] sm:$0xff] %v142_v14 }
  0xf7   :  { %266 = shalt.err (!%p263_p0)
}
  0xf8   :  { %s286_s2 = smov 128   ;;  %s287_s27 = smov 8  }
  0xf9   :  { %168 = dma.vmem_to_hbm [thread:$0]  %s163_s25, 512, %s323_s3, [#allocation4], %s286_s2, %s286_s2, %s287_s27  }
  0xfa   :  { %279 = dma.done.wait [#allocation4], 512  }
  0xfb   :  { %280 = vsyncadd [#allocation4], 4294966784 }
  0xfc   :  { %172 = vsyncpa [#allocation3], 1 }
  0xfd   :  { %173 = vsyncpa [#allocation6], 1 }
  0xfe   :  { %174 = vsyncpa [#allocation4], 1 }

</bundles_post_ra>
